<compile_context>
chip_gen: v7x
topology: tpu7x:2x2x1
jax: 0.10.0
libtpu: 0.0.40
codegen_flags: <defaults>
</compile_context>

<pallas_src>
import functools

import jax
import jax.numpy as jnp
from jax.experimental import pallas as pl
from jax.experimental.pallas import tpu as pltpu


def _round_up(x, m):
    return ((x + m - 1) // m) * m


def _nt_xent_kernel(zrow_ref, znt_ref, colbias_ref, pos_ref, out_ref, *,
                    bw, half, shift_const, use_row_max):
    # zrow_ref   : (tm, d_pad)    bf16  row tile of normalized, temp-folded z
    # znt_ref    : (d_pad, n_pad) bf16  same embeddings, transposed (grid-invariant)
    # colbias_ref: (1, n_pad)     f32   -1e30 on padded columns; also carries the
    #                                   -1/temperature shift on the constant path
    # pos_ref    : (tm, 1)        f32   positive logit per row (precomputed)
    # out_ref    : (1, 1, 1)      f32   per-tile partial sum of CE terms
    tm = zrow_ref.shape[0]
    n_pad = znt_ref.shape[1]
    r0 = pl.program_id(0) * tm

    # (tm, n_pad) logits slab on the MXU: bf16 operands, f32 accumulation.
    # 1/temperature is already folded into both operands (sqrt split).
    sim = jnp.dot(zrow_ref[...], znt_ref[...],
                  preferred_element_type=jnp.float32)

    # Padded-column mask (+ optional constant logsumexp shift): one add.
    sim = sim + colbias_ref[...]

    # Diagonal (self-similarity) mask: one iota + compare + select.
    col = jax.lax.broadcasted_iota(jnp.int32, (tm, n_pad), 1)
    row_ids = jax.lax.broadcasted_iota(jnp.int32, (tm, 1), 0) + r0
    sim = jnp.where(col == row_ids, jnp.float32(-1e30), sim)

    if use_row_max:
        # Tiny-temperature fallback: per-row max keeps the lse numerically safe.
        m = jnp.max(sim, axis=-1, keepdims=True)
        lse = jnp.log(jnp.sum(jnp.exp(sim - m), axis=-1, keepdims=True)) + m
    else:
        # Logits are bounded by 1/temperature (cosine <= 1); the shift is
        # already folded into colbias so exp() is applied directly.
        lse = (jnp.log(jnp.sum(jnp.exp(sim), axis=-1, keepdims=True))
               + jnp.float32(shift_const))

    # CE(label = positive) per row is lse - pos; padded rows contribute 0
    # (select, not multiply, so a padded-row lse can never produce NaN).
    row_real = jnp.logical_or(
        row_ids < bw,
        jnp.logical_and(row_ids >= half, row_ids < half + bw))
    contrib = jnp.where(row_real, lse - pos_ref[...], jnp.float32(0.0))
    out_ref[...] = jnp.broadcast_to(jnp.sum(contrib), (1, 1, 1))


def _chip_budgets():
    # (default row tile, slab budget for tm sizing, cap on requested scoped VMEM)
    try:
        kind = jax.devices()[0].device_kind.lower()
    except Exception:
        kind = ""
    if ("v5 lite" in kind or "v5e" in kind or "v5litepod" in kind
            or "v6" in kind):
        # v5e / v6e: 128 MiB physical VMEM, single TensorCore.
        return dict(block_rows=512, slab_budget=80 << 20, vmem_cap=96 << 20)
    # v7x / unknown: assume 64 MiB physical VMEM per core; leave headroom.
    return dict(block_rows=256, slab_budget=36 << 20, vmem_cap=48 << 20)


def nt_xent_loss(z_i, z_j, temperature=0.5, world_size=1, block_rows=None):
    """NT-Xent (SimCLR) loss. z_i, z_j: (rows, dim). Returns scalar f32 loss.

    For world_size > 1 the caller must pass already all-gathered embeddings
    (rows = batch * world_size); the kernel has no cross-host gather.
    """
    assert z_i.shape == z_j.shape and z_i.ndim == 2
    del world_size  # rows per view are assumed to already include world_size
    bw = int(z_i.shape[0])            # rows per view
    dim = int(z_i.shape[1])
    n = 2 * bw                        # number of real rows / CE terms
    inv_temp = 1.0 / float(temperature)
    use_row_max = float(temperature) < 0.03   # constant-bound shift otherwise

    budgets = _chip_budgets()
    if block_rows is None:
        block_rows = budgets["block_rows"]
    assert block_rows % 8 == 0

    d_pad = _round_up(dim, 128)

    def _layout(tm_):
        half_ = _round_up(bw, max(tm_ // 2, 4))
        return half_, 2 * half_

    def _vmem_est(tm_, n_pad_):
        return (2 * tm_ * d_pad * 2          # LHS row tile, double-buffered bf16
                + d_pad * n_pad_ * 2         # transposed RHS, single-buffered bf16
                + 2 * n_pad_ * 4 + 2 * tm_ * 4 + 4096
                + 4 * tm_ * n_pad_ * 4)      # (tm, n_pad) f32 temporaries

    tm = min(block_rows, _round_up(n, 8))
    half, n_pad = _layout(tm)
    while tm > 64 and _vmem_est(tm, n_pad) > budgets["slab_budget"]:
        tm = max(8, _round_up(tm // 2, 8))
        half, n_pad = _layout(tm)
    grid = (n_pad // tm,)

    # ---- O(N*D) prep outside the kernel (fused by XLA with pad/concat) ----
    scale = inv_temp ** 0.5           # sqrt(1/temp) folded into both operands
    def _pad_view(v):
        return jnp.pad(v.astype(jnp.float32),
                       ((0, half - bw), (0, d_pad - dim)))
    z = jnp.concatenate([_pad_view(z_i), _pad_view(z_j)], axis=0)
    sq = jnp.sum(z * z, axis=-1, keepdims=True)
    # eps ~ torch.nn.CosineSimilarity's 1e-8 norm clamp (squared).
    zn = z * jax.lax.rsqrt(jnp.maximum(sq, jnp.float32(1e-16)))
    zb = (zn * jnp.float32(scale)).astype(jnp.bfloat16)   # (n_pad, d_pad)
    zbt = zb.T                                            # (d_pad, n_pad)
    zbf = zb.astype(jnp.float32)
    # Positive logit per row: partner of row i is row (i + half) mod n_pad.
    pos = jnp.sum(zbf * jnp.roll(zbf, half, axis=0), axis=-1, keepdims=True)

    colb = jnp.arange(n_pad)
    col_real = (colb < bw) | ((colb >= half) & (colb < half + bw))
    real_bias = jnp.float32(0.0 if use_row_max else -inv_temp)
    colbias = jnp.where(col_real, real_bias,
                        jnp.float32(-1e30)).reshape(1, n_pad).astype(jnp.float32)

    kernel = functools.partial(
        _nt_xent_kernel, bw=bw, half=int(half),
        shift_const=float(inv_temp), use_row_max=use_row_max)

    # Always request a scoped-VMEM limit >= the chip default, capped per chip.
    vmem_limit = int(min(budgets["vmem_cap"],
                         max(_vmem_est(tm, n_pad) + (8 << 20), 32 << 20)))

    def _run(single_buffer_rhs):
        rhs_kwargs = {}
        if single_buffer_rhs:
            # Grid-invariant block: one VMEM buffer is enough.
            rhs_kwargs["pipeline_mode"] = pl.Buffered(1)
        in_specs = [
            pl.BlockSpec((tm, d_pad), lambda i: (i, 0)),
            pl.BlockSpec((d_pad, n_pad), lambda i: (0, 0), **rhs_kwargs),
            pl.BlockSpec((1, n_pad), lambda i: (0, 0)),
            pl.BlockSpec((tm, 1), lambda i: (i, 0)),
        ]
        return pl.pallas_call(
            kernel,
            grid=grid,
            in_specs=in_specs,
            out_specs=pl.BlockSpec((1, 1, 1), lambda i: (i, 0, 0)),
            out_shape=jax.ShapeDtypeStruct((grid[0], 1, 1), jnp.float32),
            compiler_params=pltpu.CompilerParams(
                dimension_semantics=("parallel",),
                vmem_limit_bytes=vmem_limit),
        )(zb, zbt, colbias, pos)

    try:
        partials = _run(True)
    except Exception:
        # Fallback if pipeline_mode=pl.Buffered(1) is unsupported on this
        # jax/Mosaic version: default double-buffering (correctness identical).
        partials = _run(False)

    return jnp.sum(partials) * jnp.float32(1.0 / n)


def _reference_loss(z_i, z_j, temperature, match_kernel_precision=False):
    """Plain-JAX NT-Xent reference (intended semantics of the torch module)."""
    bw = z_i.shape[0]
    n = 2 * bw
    z = jnp.concatenate([z_i, z_j], axis=0).astype(jnp.float32)
    zn = z * jax.lax.rsqrt(
        jnp.maximum(jnp.sum(z * z, axis=-1, keepdims=True), 1e-16))
    if match_kernel_precision:
        scale = (1.0 / float(temperature)) ** 0.5
        zb = (zn * jnp.float32(scale)).astype(jnp.bfloat16)
        sim = jnp.dot(zb, zb.T, preferred_element_type=jnp.float32)
        zbf = zb.astype(jnp.float32)
        pos = jnp.sum(zbf * jnp.roll(zbf, bw, axis=0), axis=-1)
    else:
        sim = jnp.dot(zn, zn.T) / temperature
        pos = jnp.sum(zn * jnp.roll(zn, bw, axis=0), axis=-1) / temperature
    sim_nodiag = jnp.where(jnp.eye(n, dtype=bool), -jnp.inf, sim)
    m = jnp.max(sim_nodiag, axis=-1, keepdims=True)
    lse = jnp.log(jnp.sum(jnp.exp(sim_nodiag - m), axis=-1)) + m[:, 0]
    return jnp.sum(lse - pos) / n


def _check(z_i, z_j, temperature, **kwargs):
    loss = nt_xent_loss(z_i, z_j, temperature=temperature, **kwargs)
    loss = jax.block_until_ready(loss)
    ref_exact = _reference_loss(z_i, z_j, temperature,
                                match_kernel_precision=True)
    ref_f32 = _reference_loss(z_i, z_j, temperature)
    assert jnp.isfinite(loss), loss
    assert jnp.allclose(loss, ref_exact, rtol=1e-3, atol=1e-3), (loss, ref_exact)
    assert jnp.allclose(loss, ref_f32, rtol=5e-2, atol=5e-2), (loss, ref_f32)
    return loss


if __name__ == "__main__":
    key = jax.random.PRNGKey(0)
    k1, k2, k3, k4 = jax.random.split(key, 4)
    temperature = 0.5

    # Small deterministic example: batch=2, hidden=32 (single-tile grid).
    z_i = jax.random.normal(k1, (2, 32), dtype=jnp.float32)
    z_j = jax.random.normal(k2, (2, 32), dtype=jnp.float32)
    _check(z_i, z_j, temperature)

    # Multi-tile grid + row/feature padding path (batch=48, hidden=96,
    # block_rows=64 -> grid=2, half=64 > batch).
    z_i2 = jax.random.normal(k3, (48, 96), dtype=jnp.float32)
    z_j2 = jax.random.normal(k4, (48, 96), dtype=jnp.float32)
    _check(z_i2, z_j2, temperature, block_rows=64)

    # TODO(synk): the reference forward's debug block (prints, arange overwrite
    # of sim, hard-coded num_transforms=3 re-masking, exit()) is dead/debug code
    # with no Pallas equivalent; only the real NT-Xent path is implemented.
    # TODO(synk): torch.distributed gathering for world_size > 1 must happen
    # outside the kernel (pass already all-gathered z_i / z_j).
    print("KERNEL_OK")
</pallas_src>

<mosaic_0001>
module attributes {stable_mosaic.version = 11 : i64} {
  func.func @_nt_xent_kernel(%arg0: i32, %arg1: memref<8x128xbf16, #tpu.memory_space<vmem>>, %arg2: memref<128x8xbf16, #tpu.memory_space<vmem>>, %arg3: memref<1x8xf32, #tpu.memory_space<vmem>>, %arg4: memref<8x1xf32, #tpu.memory_space<vmem>>, %arg5: memref<1x1x1xf32, #tpu.memory_space<vmem>>) attributes {dimension_semantics = [#tpu.dimension_semantics<parallel>], iteration_bounds = array<i64: 1>, scalar_prefetch = 0 : i64, scratch_operands = 0 : i64, tpu.core_type = #tpu.core_type<tc>, window_params = [{transform_indices = @transform_0, window_bounds = array<i64: 8, 128>}, {pipeline_mode = #tpu.pipeline_mode<synchronous>, transform_indices = @transform_1, window_bounds = array<i64: 128, 8>}, {pipeline_mode = #tpu.pipeline_mode<synchronous>, transform_indices = @transform_2, window_bounds = array<i64: 1, 8>}, {transform_indices = @transform_3, window_bounds = array<i64: 8, 1>}, {transform_indices = @transform_4, window_bounds = array<i64: 1, 1, 1>}]} {
    %c8_i32 = arith.constant 8 : i32
    %0 = arith.muli %arg0, %c8_i32 : i32
    %c0 = arith.constant 0 : index
    %c0_0 = arith.constant 0 : index
    %1 = vector.load %arg1[%c0, %c0_0] : memref<8x128xbf16, #tpu.memory_space<vmem>>, vector<8x128xbf16>
    %c0_1 = arith.constant 0 : index
    %c0_2 = arith.constant 0 : index
    %2 = vector.load %arg2[%c0_1, %c0_2] : memref<128x8xbf16, #tpu.memory_space<vmem>>, vector<128x8xbf16>
    %cst = arith.constant dense<0.000000e+00> : vector<8x8xf32>
    %3 = tpu.matmul %1, %2, %cst {dimension_numbers = #tpu.dot_dimension_numbers<[1], [0], [0], [1], [0, 0, 1, 1], [], []>} : vector<8x128xbf16>, vector<128x8xbf16>, vector<8x8xf32> -> vector<8x8xf32>
    %c0_3 = arith.constant 0 : index
    %c0_4 = arith.constant 0 : index
    %4 = vector.load %arg3[%c0_3, %c0_4] : memref<1x8xf32, #tpu.memory_space<vmem>>, vector<1x8xf32>
    %5 = vector.broadcast %4 : vector<1x8xf32> to vector<8x8xf32>
    %6 = arith.addf %3, %5 : vector<8x8xf32>
    %7 = tpu.iota {dimensions = array<i32: 1>} : vector<8x8xi32>
    %8 = tpu.iota {dimensions = array<i32: 0>} : vector<8x1xi32>
    %9 = vector.broadcast %0 : i32 to vector<8x1xi32>
    %10 = arith.addi %8, %9 : vector<8x1xi32>
    %11 = vector.broadcast %10 : vector<8x1xi32> to vector<8x8xi32>
    %12 = arith.cmpi eq, %7, %11 : vector<8x8xi32>
    %cst_5 = arith.constant -1.000000e+30 : f32
    %13 = vector.broadcast %cst_5 : f32 to vector<8x8xf32>
    %14 = arith.select %12, %13, %6 : vector<8x8xi1>, vector<8x8xf32>
    %15 = math.exp %14 : vector<8x8xf32>
    %cst_6 = arith.constant dense<0.000000e+00> : vector<8xf32>
    %16 = vector.multi_reduction <add>, %15, %cst_6 [1] : vector<8x8xf32> to vector<8xf32>
    %17 = vector.shape_cast %16 : vector<8xf32> to vector<8x1xf32>
    %18 = math.log %17 : vector<8x1xf32>
    %cst_7 = arith.constant 2.000000e+00 : f32
    %19 = vector.broadcast %cst_7 : f32 to vector<8x1xf32>
    %20 = arith.addf %18, %19 : vector<8x1xf32>
    %c2_i32 = arith.constant 2 : i32
    %21 = vector.broadcast %c2_i32 : i32 to vector<8x1xi32>
    %22 = arith.cmpi slt, %10, %21 : vector<8x1xi32>
    %c4_i32 = arith.constant 4 : i32
    %23 = vector.broadcast %c4_i32 : i32 to vector<8x1xi32>
    %24 = arith.cmpi sge, %10, %23 : vector<8x1xi32>
    %c6_i32 = arith.constant 6 : i32
    %25 = vector.broadcast %c6_i32 : i32 to vector<8x1xi32>
    %26 = arith.cmpi slt, %10, %25 : vector<8x1xi32>
    %27 = arith.andi %24, %26 : vector<8x1xi1>
    %28 = arith.ori %22, %27 : vector<8x1xi1>
    %c0_8 = arith.constant 0 : index
    %c0_9 = arith.constant 0 : index
    %29 = vector.load %arg4[%c0_8, %c0_9] : memref<8x1xf32, #tpu.memory_space<vmem>>, vector<8x1xf32>
    %30 = arith.subf %20, %29 : vector<8x1xf32>
    %cst_10 = arith.constant 0.000000e+00 : f32
    %31 = vector.broadcast %cst_10 : f32 to vector<8x1xf32>
    %32 = arith.select %28, %30, %31 : vector<8x1xi1>, vector<8x1xf32>
    %33 = vector.shape_cast %32 : vector<8x1xf32> to vector<1x8x1xf32>
    %cst_11 = arith.constant dense<0.000000e+00> : vector<1xf32>
    %34 = vector.multi_reduction <add>, %33, %cst_11 [1, 2] : vector<1x8x1xf32> to vector<1xf32>
    %35 = vector.shape_cast %34 : vector<1xf32> to vector<1x1x1xf32>
    %36 = vector.extract %35[0, 0, 0] : f32 from vector<1x1x1xf32>
    %37 = vector.broadcast %36 : f32 to vector<1x1x1xf32>
    %c0_12 = arith.constant 0 : index
    %c0_13 = arith.constant 0 : index
    %c0_14 = arith.constant 0 : index
    %38 = vector.load %arg5[%c0_12, %c0_13, %c0_14] : memref<1x1x1xf32, #tpu.memory_space<vmem>>, vector<1x1x1xf32>
    tpu.vector_store %arg5[%c0_12, %c0_13, %c0_14], %37 {strides = array<i32>} : memref<1x1x1xf32, #tpu.memory_space<vmem>>, vector<1x1x1xf32>,
    return
  }
  func.func @transform_0(%arg0: i32) -> (i32, i32) {
    %c0_i32 = arith.constant 0 : i32
    %c0_i32_0 = arith.constant 0 : i32
    return %arg0, %c0_i32 : i32, i32
  }
  func.func @transform_1(%arg0: i32) -> (i32, i32) {
    %c0_i32 = arith.constant 0 : i32
    %c0_i32_0 = arith.constant 0 : i32
    %c0_i32_1 = arith.constant 0 : i32
    return %c0_i32, %c0_i32_0 : i32, i32
  }
  func.func @transform_2(%arg0: i32) -> (i32, i32) {
    %c0_i32 = arith.constant 0 : i32
    %c0_i32_0 = arith.constant 0 : i32
    %c0_i32_1 = arith.constant 0 : i32
    return %c0_i32, %c0_i32_0 : i32, i32
  }
  func.func @transform_3(%arg0: i32) -> (i32, i32) {
    %c0_i32 = arith.constant 0 : i32
    %c0_i32_0 = arith.constant 0 : i32
    return %arg0, %c0_i32 : i32, i32
  }
  func.func @transform_4(%arg0: i32) -> (i32, i32, i32) {
    %c0_i32 = arith.constant 0 : i32
    %c0_i32_0 = arith.constant 0 : i32
    %c0_i32_1 = arith.constant 0 : i32
    return %arg0, %c0_i32, %c0_i32_0 : i32, i32, i32
  }
}

module attributes {stable_mosaic.version = 11 : i64} {
  func.func @_nt_xent_kernel(%arg0: i32, %arg1: memref<8x128xbf16, #tpu.memory_space<vmem>>, %arg2: memref<128x8xbf16, #tpu.memory_space<vmem>>, %arg3: memref<1x8xf32, #tpu.memory_space<vmem>>, %arg4: memref<8x1xf32, #tpu.memory_space<vmem>>, %arg5: memref<1x1x1xf32, #tpu.memory_space<vmem>>) attributes {dimension_semantics = [#tpu.dimension_semantics<parallel>], iteration_bounds = array<i64: 1>, scalar_prefetch = 0 : i64, scratch_operands = 0 : i64, tpu.core_type = #tpu.core_type<tc>, window_params = [{transform_indices = @transform_0, window_bounds = array<i64: 8, 128>}, {pipeline_mode = #tpu.pipeline_mode<synchronous>, transform_indices = @transform_1, window_bounds = array<i64: 128, 8>}, {pipeline_mode = #tpu.pipeline_mode<synchronous>, transform_indices = @transform_2, window_bounds = array<i64: 1, 8>}, {transform_indices = @transform_3, window_bounds = array<i64: 8, 1>}, {transform_indices = @transform_4, window_bounds = array<i64: 1, 1, 1>}]} {
    %c8_i32 = arith.constant 8 : i32
    %0 = arith.muli %arg0, %c8_i32 : i32
    %c0 = arith.constant 0 : index
    %c0_0 = arith.constant 0 : index
    %1 = vector.load %arg1[%c0, %c0_0] : memref<8x128xbf16, #tpu.memory_space<vmem>>, vector<8x128xbf16>
    %c0_1 = arith.constant 0 : index
    %c0_2 = arith.constant 0 : index
    %2 = vector.load %arg2[%c0_1, %c0_2] : memref<128x8xbf16, #tpu.memory_space<vmem>>, vector<128x8xbf16>
    %cst = arith.constant dense<0.000000e+00> : vector<8x8xf32>
    %3 = tpu.matmul %1, %2, %cst {dimension_numbers = #tpu.dot_dimension_numbers<[1], [0], [0], [1], [0, 0, 1, 1], [], []>} : vector<8x128xbf16>, vector<128x8xbf16>, vector<8x8xf32> -> vector<8x8xf32>
    %c0_3 = arith.constant 0 : index
    %c0_4 = arith.constant 0 : index
    %4 = vector.load %arg3[%c0_3, %c0_4] : memref<1x8xf32, #tpu.memory_space<vmem>>, vector<1x8xf32>
    %5 = vector.broadcast %4 : vector<1x8xf32> to vector<8x8xf32>
    %6 = arith.addf %3, %5 : vector<8x8xf32>
    %7 = tpu.iota {dimensions = array<i32: 1>} : vector<8x8xi32>
    %8 = tpu.iota {dimensions = array<i32: 0>} : vector<8x1xi32>
    %9 = vector.broadcast %0 : i32 to vector<8x1xi32>
    %10 = arith.addi %8, %9 : vector<8x1xi32>
    %11 = vector.broadcast %10 : vector<8x1xi32> to vector<8x8xi32>
    %12 = arith.cmpi eq, %7, %11 : vector<8x8xi32>
    %cst_5 = arith.constant -1.000000e+30 : f32
    %13 = vector.broadcast %cst_5 : f32 to vector<8x8xf32>
    %14 = arith.select %12, %13, %6 : vector<8x8xi1>, vector<8x8xf32>
    %15 = math.exp %14 : vector<8x8xf32>
    %cst_6 = arith.constant dense<0.000000e+00> : vector<8xf32>
    %16 = vector.multi_reduction <add>, %15, %cst_6 [1] : vector<8x8xf32> to vector<8xf32>
    %17 = vector.shape_cast %16 : vector<8xf32> to vector<8x1xf32>
    %18 = math.log %17 : vector<8x1xf32>
    %cst_7 = arith.constant 2.000000e+00 : f32
    %19 = vector.broadcast %cst_7 : f32 to vector<8x1xf32>
    %20 = arith.addf %18, %19 : vector<8x1xf32>
    %c2_i32 = arith.constant 2 : i32
    %21 = vector.broadcast %c2_i32 : i32 to vector<8x1xi32>
    %22 = arith.cmpi slt, %10, %21 : vector<8x1xi32>
    %c4_i32 = arith.constant 4 : i32
    %23 = vector.broadcast %c4_i32 : i32 to vector<8x1xi32>
    %24 = arith.cmpi sge, %10, %23 : vector<8x1xi32>
    %c6_i32 = arith.constant 6 : i32
    %25 = vector.broadcast %c6_i32 : i32 to vector<8x1xi32>
    %26 = arith.cmpi slt, %10, %25 : vector<8x1xi32>
    %27 = arith.andi %24, %26 : vector<8x1xi1>
    %28 = arith.ori %22, %27 : vector<8x1xi1>
    %c0_8 = arith.constant 0 : index
    %c0_9 = arith.constant 0 : index
    %29 = vector.load %arg4[%c0_8, %c0_9] : memref<8x1xf32, #tpu.memory_space<vmem>>, vector<8x1xf32>
    %30 = arith.subf %20, %29 : vector<8x1xf32>
    %cst_10 = arith.constant 0.000000e+00 : f32
    %31 = vector.broadcast %cst_10 : f32 to vector<8x1xf32>
    %32 = arith.select %28, %30, %31 : vector<8x1xi1>, vector<8x1xf32>
    %33 = vector.shape_cast %32 : vector<8x1xf32> to vector<1x8x1xf32>
    %cst_11 = arith.constant dense<0.000000e+00> : vector<1xf32>
    %34 = vector.multi_reduction <add>, %33, %cst_11 [1, 2] : vector<1x8x1xf32> to vector<1xf32>
    %35 = vector.shape_cast %34 : vector<1xf32> to vector<1x1x1xf32>
    %36 = vector.extract %35[0, 0, 0] : f32 from vector<1x1x1xf32>
    %37 = vector.broadcast %36 : f32 to vector<1x1x1xf32>
    %c0_12 = arith.constant 0 : index
    %c0_13 = arith.constant 0 : index
    %c0_14 = arith.constant 0 : index
    %38 = vector.load %arg5[%c0_12, %c0_13, %c0_14] : memref<1x1x1xf32, #tpu.memory_space<vmem>>, vector<1x1x1xf32>
    tpu.vector_store %arg5[%c0_12, %c0_13, %c0_14], %37 {strides = array<i32>} : memref<1x1x1xf32, #tpu.memory_space<vmem>>, vector<1x1x1xf32>,
    return
  }
  func.func @transform_0(%arg0: i32) -> (i32, i32) {
    %c0_i32 = arith.constant 0 : i32
    %c0_i32_0 = arith.constant 0 : i32
    return %arg0, %c0_i32 : i32, i32
  }
  func.func @transform_1(%arg0: i32) -> (i32, i32) {
    %c0_i32 = arith.constant 0 : i32
    %c0_i32_0 = arith.constant 0 : i32
    %c0_i32_1 = arith.constant 0 : i32
    return %c0_i32, %c0_i32_0 : i32, i32
  }
  func.func @transform_2(%arg0: i32) -> (i32, i32) {
    %c0_i32 = arith.constant 0 : i32
    %c0_i32_0 = arith.constant 0 : i32
    %c0_i32_1 = arith.constant 0 : i32
    return %c0_i32, %c0_i32_0 : i32, i32
  }
  func.func @transform_3(%arg0: i32) -> (i32, i32) {
    %c0_i32 = arith.constant 0 : i32
    %c0_i32_0 = arith.constant 0 : i32
    return %arg0, %c0_i32 : i32, i32
  }
  func.func @transform_4(%arg0: i32) -> (i32, i32, i32) {
    %c0_i32 = arith.constant 0 : i32
    %c0_i32_0 = arith.constant 0 : i32
    %c0_i32_1 = arith.constant 0 : i32
    return %arg0, %c0_i32, %c0_i32_0 : i32, i32, i32
  }
}

</mosaic_0001>

<bundles_post_ra>
// kernel: tpu_custom_call.1
= control target key start
LH: loop header
LB: loop body
LE: loop exit
PB: predicated region body
PF: predicated region fallthrough
CT: control target
= control target key end

     0   :  { %v264_v1 = vmov 0.0   ;;  %vm265_vm0 = vmmov 0   ;;  %s337_s0 = inlined_call_operand.vmem [shape: bf16[8,128], index: 0, kind: input, shape index: {}]   ;;  %s338_s1 = inlined_call_operand.vmem [shape: bf16[128,8], index: 1, kind: input, shape index: {}]   ;;  %s339_s2 = inlined_call_operand.vmem [shape: f32[1,8], index: 2, kind: input, shape index: {}]   ;;  %s340_s3 = inlined_call_operand.vmem [shape: f32[8,1], index: 3, kind: input, shape index: {}]   ;;  %s341_s4 = inlined_call_operand.hbm [shape: f32[1,1,1], index: 4, kind: output, shape index: {}]  }
   0x1   :  { %v228_v0 = vld [vmem:[%s338_s1] sm:$0xff]   ;;  %203 = vmatprep.subr.bf16.mxu0 %v264_v1  ;;  %v229_v2 = vld [vmem:[%s338_s1 + $0x8] sm:$0xff]   ;;  %219 = vmatprep.mubr.msk.bf16.mxu0 %vm265_vm0, %v264_v1  ;;  %v230_v3 = vld [vmem:[%s338_s1 + $0x10] sm:$0xff]  }
   0x2   :  { %204 = vmatpush3.bf16.msra.mxu0 %v228_v0 }
   0x3   :  { %205 = vmatprep.subr.bf16.mxu0 %v264_v1 }
   0x6   :  { %206 = vmatpush3.bf16.msra.mxu0 %v229_v2 }
   0x7   :  { %207 = vmatprep.subr.bf16.mxu0 %v264_v1 }
   0x8   :  { %9 = vsyncpa [#allocation3], 0  ;;  %v231_v4 = vld [vmem:[%s338_s1 + $0x18] sm:$0xff]   ;;  %v232_v5 = vld [vmem:[%s338_s1 + $0x20] sm:$0xff]   ;;  %v132_v10 = vlaneseq  ;;  %vm142_vm2 = vcmask 64512   ;;  %vm157_vm8 = vcmask 7168  }
   0x9   :  { %v233_v6 = vld [vmem:[%s338_s1 + $0x28] sm:$0xff]   ;;  %v234_v7 = vld [vmem:[%s338_s1 + $0x30] sm:$0xff]   ;;  %v235_v8 = vld [vmem:[%s338_s1 + $0x38] sm:$0xff]   ;;  %vm169_vm9 = vcmask 0  }
   0xa   :  { %208 = vmatpush3.bf16.msra.mxu0 %v230_v3  ;;  %v20_v9 = vld [vmem:[%s337_s0] sm:$0xf]  ;;  %v133_v11 = vand.u32 127, %v132_v10  ;;  %v135_v12 = vshrl.u32 %v132_v10, 7 }
   0xb   :  { %209 = vmatprep.subr.bf16.mxu0 %v264_v1  ;;  %v185_v13 = vld [vmem:[%s339_s2] ss:$0 sm:$0xff]  ;;  %s266_s2 = smov [#allocation2]  }
   0xc   :  { %vm138_vm1 = vcmp.eq.s32.totalorder %v133_v11, %v135_v12  ;;  %vm150_vm3 = vcmp.ge.s32.totalorder %v135_v12, 4  ;;  %vm151_vm4 = vcmp.lt.s32.totalorder %v135_v12, 6  ;;  %vm149_vm5 = vcmp.lt.s32.totalorder %v135_v12, 2  ;;  %v154_v26 = vld [vmem:[%s340_s3] sm:$0xff]  ;;  %s177_s9 = sshll.u32 %s266_s2, 4  ;;  %s178_s9 = int_to_ptr.vmem [resolvable:$true] %s177_s9 }
   0xd   :  { %vm152_vm6 = vmand %vm150_vm3, %vm151_vm4  ;;  %s240_s3 = scalar_lea.vmem %s178_s9, 16  ;;  %s244_s11 = scalar_lea.vmem %s178_s9, 32 }
   0xe   :  { %210 = vmatpush3.bf16.msra.mxu0 %v231_v4  ;;  %vm153_vm7 = vmor %vm149_vm5, %vm152_vm6  ;;  %p241_p0 = scmp.ne.s32.totalorder %s178_s9, %s240_s3  ;;  %p245_p1 = scmp.lt.s32.totalorder %s178_s9, %s178_s9 }
   0xf   :  { %211 = vmatprep.subr.bf16.mxu0 %v264_v1  ;;  %p246_p2 = scmp.lt.s32.totalorder %s244_s11, %s240_s3 }
  0x11   :  { %p247_p3 = por %p246_p2, %p245_p1 }
  0x12   :  { %212 = vmatpush3.bf16.msra.mxu0 %v232_v5 }
  0x13   :  { %213 = vmatprep.subr.bf16.mxu0 %v264_v1  ;;  %p248_p4 = pnand %p247_p3, %p241_p0 }
  0x16   :  { %214 = vmatpush3.bf16.msra.mxu0 %v233_v6 }
  0x17   :  { %215 = vmatprep.subr.bf16.mxu0 %v264_v1 }
  0x1a   :  { %216 = vmatpush3.bf16.msra.mxu0 %v234_v7 }
  0x1b   :  { %217 = vmatprep.subr.bf16.mxu0 %v264_v1 }
  0x1e   :  { %218 = vmatpush3.bf16.msra.mxu0 %v235_v8 }
  0x21   :  { %220 = vmatmul.mubr.bf16.vlgmr.msra.gmra.mrb[0].mxu0 %v20_v9 }
  0xf4   :  { %v126_v14 = vpop.f32.mrb[0].mxu0 }
  0xf5   :  { %v127_v15 = vadd.f32 %v185_v13, %v126_v14  ;;  %v221_v16 = vpop.f32.mrb[1].mxu0 }
  0xf6   :  { %v129_v17 = vpop.f32.mrb[2].mxu0 }
  0xf7   :  { %v139_v18 = vsel %vm138_vm1, -1e+30, %v127_v15  ;;  %v222_v19 = vpop.f32.mrb[3].mxu0 }
  0xf8   :  { %v140_v20 = vmul.f32 1.442695, %v139_v18 }
  0xfa   :  { %236 = vpow2.f32 %v140_v20 }
 0x104   :  { %v237_v21 = vpop.eup %236 }
 0x105   :  { %v143_v22 = vsel %vm142_vm2, %v237_v21, 0.0 }
 0x106   :  { %144 = vadd.xlane.f32.xlu0 %v143_v22 }
 0x193   :  { %v145_v23 = vpop.xlane.xlu0 %144 }
 0x194   :  { %238 = vlog2.f32 %v145_v23 }
 0x19e   :  { %v239_v24 = vpop.eup %238 }
 0x19f   :  { %v147_v25 = vmul.f32 0.6931472, %v239_v24 }
 0x1a1   :  { %v148_v27 = vadd.f32 2.0, %v147_v25 }
 0x1a3   :  { %v155_v28 = vsub.f32 %v148_v27, %v154_v26 }
 0x1a5   :  { %v156_v29 = vsel %vm153_vm7, %v155_v28, 0.0 }
 0x1a6   :  { %v158_v30 = vsel %vm157_vm8, %v156_v29, 0.0 }
 0x1a7   :  { %159 = vadd.xlane.f32.xlu0 %v158_v30 }
 0x234   :  { %v160_v31 = vpop.xlane.xlu0 %159 }
 0x235   :  { %v161_v32 = vrot.slane %v160_v31, 4 }
 0x237   :  { %v162_v33 = vadd.f32 %v161_v32, %v160_v31 }
 0x239   :  { %v163_v34 = vrot.slane %v162_v33, 2 }
 0x23b   :  { %v164_v35 = vadd.f32 %v163_v34, %v162_v33 }
 0x23d   :  { %v165_v36 = vrot.slane %v164_v35, 1 }
 0x23f   :  { %v166_v37 = vadd.f32 %v165_v36, %v164_v35 }
 0x241   :  { %223 = vpush %v166_v37 }
 0x272   :  { %s224_s10 = spop %223 }
 0x273   :  { %v168_v38 = vstv %s224_s10 }
 0x274   :  { %170 = vst.msk [vmem:[#allocation2] sm:$0x1] %vm169_vm9, %v168_v38 }
 0x275   :  { %251 = shalt.err (!%p248_p4)
}
 0x276   :  { %s252_s14 = scalar_lea.hbm %s341_s4, 16 }
 0x277   :  { %p253_p5 = scmp.ne.s32.totalorder %s341_s4, %s252_s14  ;;  %p256_p6 = scmp.lt.u32.totalorder %s252_s14, %s341_s4 }
 0x279   :  { %p258_p7 = pnand %p256_p6, %p253_p5 }
 0x27b   :  { %261 = shalt.err (!%p258_p7)
}
 0x27c   :  { %180 = dma.vmem_to_hbm [thread:$0]  %s178_s9, 16, %s341_s4, [#allocation3]  }
 0x27d   :  { %262 = dma.done.wait [#allocation3], 16  }
 0x27e   :  { %263 = vsyncadd [#allocation3], 4294967280 }
 0x27f   :  { %184 = vsyncpa [#allocation3], 1 }

// kernel: tpu_custom_call.1
= control target key start
LH: loop header
LB: loop body
LE: loop exit
PB: predicated region body
PF: predicated region fallthrough
CT: control target
= control target key end

     0   :  { %v264_v1 = vmov 0.0   ;;  %vm265_vm0 = vmmov 0   ;;  %s337_s0 = inlined_call_operand.vmem [shape: bf16[8,128], index: 0, kind: input, shape index: {}]   ;;  %s338_s1 = inlined_call_operand.vmem [shape: bf16[128,8], index: 1, kind: input, shape index: {}]   ;;  %s339_s2 = inlined_call_operand.vmem [shape: f32[1,8], index: 2, kind: input, shape index: {}]   ;;  %s340_s3 = inlined_call_operand.vmem [shape: f32[8,1], index: 3, kind: input, shape index: {}]   ;;  %s341_s4 = inlined_call_operand.hbm [shape: f32[1,1,1], index: 4, kind: output, shape index: {}]  }
   0x1   :  { %v228_v0 = vld [vmem:[%s338_s1] sm:$0xff]   ;;  %203 = vmatprep.subr.bf16.mxu0 %v264_v1  ;;  %v229_v2 = vld [vmem:[%s338_s1 + $0x8] sm:$0xff]   ;;  %219 = vmatprep.mubr.msk.bf16.mxu0 %vm265_vm0, %v264_v1  ;;  %v230_v3 = vld [vmem:[%s338_s1 + $0x10] sm:$0xff]  }
   0x2   :  { %204 = vmatpush3.bf16.msra.mxu0 %v228_v0 }
   0x3   :  { %205 = vmatprep.subr.bf16.mxu0 %v264_v1 }
   0x6   :  { %206 = vmatpush3.bf16.msra.mxu0 %v229_v2 }
   0x7   :  { %207 = vmatprep.subr.bf16.mxu0 %v264_v1 }
   0x8   :  { %9 = vsyncpa [#allocation3], 0  ;;  %v231_v4 = vld [vmem:[%s338_s1 + $0x18] sm:$0xff]   ;;  %v232_v5 = vld [vmem:[%s338_s1 + $0x20] sm:$0xff]   ;;  %v132_v10 = vlaneseq  ;;  %vm142_vm2 = vcmask 64512   ;;  %vm157_vm8 = vcmask 7168  }
   0x9   :  { %v233_v6 = vld [vmem:[%s338_s1 + $0x28] sm:$0xff]   ;;  %v234_v7 = vld [vmem:[%s338_s1 + $0x30] sm:$0xff]   ;;  %v235_v8 = vld [vmem:[%s338_s1 + $0x38] sm:$0xff]   ;;  %vm169_vm9 = vcmask 0  }
   0xa   :  { %208 = vmatpush3.bf16.msra.mxu0 %v230_v3  ;;  %v20_v9 = vld [vmem:[%s337_s0] sm:$0xf]  ;;  %v133_v11 = vand.u32 127, %v132_v10  ;;  %v135_v12 = vshrl.u32 %v132_v10, 7 }
   0xb   :  { %209 = vmatprep.subr.bf16.mxu0 %v264_v1  ;;  %v185_v13 = vld [vmem:[%s339_s2] ss:$0 sm:$0xff]  ;;  %s266_s2 = smov [#allocation2]  }
   0xc   :  { %vm138_vm1 = vcmp.eq.s32.totalorder %v133_v11, %v135_v12  ;;  %vm150_vm3 = vcmp.ge.s32.totalorder %v135_v12, 4  ;;  %vm151_vm4 = vcmp.lt.s32.totalorder %v135_v12, 6  ;;  %vm149_vm5 = vcmp.lt.s32.totalorder %v135_v12, 2  ;;  %v154_v26 = vld [vmem:[%s340_s3] sm:$0xff]  ;;  %s177_s9 = sshll.u32 %s266_s2, 4  ;;  %s178_s9 = int_to_ptr.vmem [resolvable:$true] %s177_s9 }
   0xd   :  { %vm152_vm6 = vmand %vm150_vm3, %vm151_vm4  ;;  %s240_s3 = scalar_lea.vmem %s178_s9, 16  ;;  %s244_s11 = scalar_lea.vmem %s178_s9, 32 }
   0xe   :  { %210 = vmatpush3.bf16.msra.mxu0 %v231_v4  ;;  %vm153_vm7 = vmor %vm149_vm5, %vm152_vm6  ;;  %p241_p0 = scmp.ne.s32.totalorder %s178_s9, %s240_s3  ;;  %p245_p1 = scmp.lt.s32.totalorder %s178_s9, %s178_s9 }
   0xf   :  { %211 = vmatprep.subr.bf16.mxu0 %v264_v1  ;;  %p246_p2 = scmp.lt.s32.totalorder %s244_s11, %s240_s3 }
  0x11   :  { %p247_p3 = por %p246_p2, %p245_p1 }
  0x12   :  { %212 = vmatpush3.bf16.msra.mxu0 %v232_v5 }
  0x13   :  { %213 = vmatprep.subr.bf16.mxu0 %v264_v1  ;;  %p248_p4 = pnand %p247_p3, %p241_p0 }
  0x16   :  { %214 = vmatpush3.bf16.msra.mxu0 %v233_v6 }
  0x17   :  { %215 = vmatprep.subr.bf16.mxu0 %v264_v1 }
  0x1a   :  { %216 = vmatpush3.bf16.msra.mxu0 %v234_v7 }
  0x1b   :  { %217 = vmatprep.subr.bf16.mxu0 %v264_v1 }
  0x1e   :  { %218 = vmatpush3.bf16.msra.mxu0 %v235_v8 }
  0x21   :  { %220 = vmatmul.mubr.bf16.vlgmr.msra.gmra.mrb[0].mxu0 %v20_v9 }
  0xf4   :  { %v126_v14 = vpop.f32.mrb[0].mxu0 }
  0xf5   :  { %v127_v15 = vadd.f32 %v185_v13, %v126_v14  ;;  %v221_v16 = vpop.f32.mrb[1].mxu0 }
  0xf6   :  { %v129_v17 = vpop.f32.mrb[2].mxu0 }
  0xf7   :  { %v139_v18 = vsel %vm138_vm1, -1e+30, %v127_v15  ;;  %v222_v19 = vpop.f32.mrb[3].mxu0 }
  0xf8   :  { %v140_v20 = vmul.f32 1.442695, %v139_v18 }
  0xfa   :  { %236 = vpow2.f32 %v140_v20 }
 0x104   :  { %v237_v21 = vpop.eup %236 }
 0x105   :  { %v143_v22 = vsel %vm142_vm2, %v237_v21, 0.0 }
 0x106   :  { %144 = vadd.xlane.f32.xlu0 %v143_v22 }
 0x193   :  { %v145_v23 = vpop.xlane.xlu0 %144 }
 0x194   :  { %238 = vlog2.f32 %v145_v23 }
 0x19e   :  { %v239_v24 = vpop.eup %238 }
 0x19f   :  { %v147_v25 = vmul.f32 0.6931472, %v239_v24 }
 0x1a1   :  { %v148_v27 = vadd.f32 2.0, %v147_v25 }
 0x1a3   :  { %v155_v28 = vsub.f32 %v148_v27, %v154_v26 }
 0x1a5   :  { %v156_v29 = vsel %vm153_vm7, %v155_v28, 0.0 }
 0x1a6   :  { %v158_v30 = vsel %vm157_vm8, %v156_v29, 0.0 }
 0x1a7   :  { %159 = vadd.xlane.f32.xlu0 %v158_v30 }
 0x234   :  { %v160_v31 = vpop.xlane.xlu0 %159 }
 0x235   :  { %v161_v32 = vrot.slane %v160_v31, 4 }
 0x237   :  { %v162_v33 = vadd.f32 %v161_v32, %v160_v31 }
 0x239   :  { %v163_v34 = vrot.slane %v162_v33, 2 }
 0x23b   :  { %v164_v35 = vadd.f32 %v163_v34, %v162_v33 }
 0x23d   :  { %v165_v36 = vrot.slane %v164_v35, 1 }
 0x23f   :  { %v166_v37 = vadd.f32 %v165_v36, %v164_v35 }
 0x241   :  { %223 = vpush %v166_v37 }
 0x272   :  { %s224_s10 = spop %223 }
 0x273   :  { %v168_v38 = vstv %s224_s10 }
 0x274   :  { %170 = vst.msk [vmem:[#allocation2] sm:$0x1] %vm169_vm9, %v168_v38 }
 0x275   :  { %251 = shalt.err (!%p248_p4)
}
 0x276   :  { %s252_s14 = scalar_lea.hbm %s341_s4, 16 }
 0x277   :  { %p253_p5 = scmp.ne.s32.totalorder %s341_s4, %s252_s14  ;;  %p256_p6 = scmp.lt.u32.totalorder %s252_s14, %s341_s4 }
 0x279   :  { %p258_p7 = pnand %p256_p6, %p253_p5 }
 0x27b   :  { %261 = shalt.err (!%p258_p7)
}
 0x27c   :  { %180 = dma.vmem_to_hbm [thread:$0]  %s178_s9, 16, %s341_s4, [#allocation3]  }
 0x27d   :  { %262 = dma.done.wait [#allocation3], 16  }
 0x27e   :  { %263 = vsyncadd [#allocation3], 4294967280 }
 0x27f   :  { %184 = vsyncpa [#allocation3], 1 }

</bundles_post_ra>
